<compile_context>
chip_gen: v5e
topology: v5e:2x2
jax: 0.10.0
libtpu: 0.0.40
codegen_flags: <defaults>
</compile_context>

<pallas_src>
import jax
import jax.numpy as jnp
from jax.experimental import pallas as pl
from jax.experimental.pallas import tpu as pltpu


def _round_up(n, m):
    return ((n + m - 1) // m) * m


def _affine_kernel(params_ref, x_ref, o_ref):
    # params_ref: SMEM f32[6] = [w00, w01, w10, w11, b0, b1]  (W stored (in,out))
    # x_ref / o_ref: VMEM (2, TILE) lane-dense blocks (row = feature, lanes = batch)
    x = x_ref[...]                    # (2, T) f32
    x0 = x[0:1, :]                    # (1, T)
    x1 = x[1:2, :]                    # (1, T)

    w00 = params_ref[0]
    w01 = params_ref[1]
    w10 = params_ref[2]
    w11 = params_ref[3]
    b0 = params_ref[4]
    b1 = params_ref[5]

    # Pure VPU: 4 broadcast multiplies + 4 adds per block, no MXU round-trip.
    y0 = x0 * w00 + x1 * w10 + b0
    y1 = x0 * w01 + x1 * w11 + b1
    o_ref[...] = jnp.concatenate([y0, y1], axis=0).astype(o_ref.dtype)


def mlp_forward(x, w1, b1, w2, b2, *, lane_tile=2048):
    """x: (N, 2) f32; w1, w2: (2, 2) stored as (in, out); b1, b2: (2,).

    Computes ((x @ w1 + b1) @ w2 + b2) == x @ (w1 @ w2) + (b1 @ w2 + b2).
    """
    n, f = x.shape
    assert f == 2, "features must be 2 (Linear(2, 2))"

    # --- fold the two affine layers in the wrapper (trivial 2x2 math) ---
    w = (w1 @ w2).astype(jnp.float32)          # (2, 2), (in, out)
    b = (b1 @ w2 + b2).astype(jnp.float32)     # (2,)
    params = jnp.concatenate([w.reshape(-1), b.reshape(-1)])  # f32[6]

    # --- lane-dense layout: (2, N_pad), batch on the 128-lane axis ---
    tile = min(lane_tile, _round_up(n, 128))
    n_pad = _round_up(n, tile)
    xt = jnp.zeros((2, n_pad), x.dtype).at[:, :n].set(x.T)
    grid = (n_pad // tile,)

    out_t = pl.pallas_call(
        _affine_kernel,
        out_shape=jax.ShapeDtypeStruct((2, n_pad), x.dtype),
        grid_spec=pltpu.PrefetchScalarGridSpec(
            num_scalar_prefetch=0,
            grid=grid,
            in_specs=[
                # 6 scalar params live in SMEM (read as scalars in the kernel).
                pl.BlockSpec(memory_space=pltpu.MemorySpace.SMEM),
                # lane-dense batch tiles, auto double-buffered over the grid.
                pl.BlockSpec((2, tile), lambda i: (0, i)),
            ],
            out_specs=pl.BlockSpec((2, tile), lambda i: (0, i)),
        ),
        compiler_params=pltpu.CompilerParams(
            # batch axis is embarrassingly parallel -> shards across TCs on v7x.
            dimension_semantics=("parallel",),
        ),
    )(params, xt)

    return out_t[:, :n].T


if __name__ == "__main__":
    key = jax.random.PRNGKey(0)
    k_x, k_w1, k_b1, k_w2, k_b2 = jax.random.split(key, 5)

    # Small, non-multiple-of-128 batch to exercise the lane-padding path.
    N = 300
    x = jax.random.normal(k_x, (N, 2), dtype=jnp.float32)

    # PyTorch Linear shapes: weight (out, in) = (2, 2), bias (2,).
    # Kernel/wrapper expects weights as (in, out): W_kernel = W_pt.T
    w1_pt = jax.random.normal(k_w1, (2, 2), dtype=jnp.float32) * 0.5
    b1 = jax.random.normal(k_b1, (2,), dtype=jnp.float32) * 0.1
    w2_pt = jax.random.normal(k_w2, (2, 2), dtype=jnp.float32) * 0.5
    b2 = jax.random.normal(k_b2, (2,), dtype=jnp.float32) * 0.1
    w1 = w1_pt.T
    w2 = w2_pt.T

    out = jax.block_until_ready(mlp_forward(x, w1, b1, w2, b2))

    # Reference: the exact un-folded composition (same value as PyTorch's x2).
    ref = (x @ w1 + b1) @ w2 + b2
    assert out.shape == (N, 2)
    assert jnp.allclose(out, ref, atol=1e-5), "mismatch vs reference"

    print("KERNEL_OK")
</pallas_src>

<mosaic_0001>
module attributes {stable_mosaic.version = 11 : i64} {
  func.func @_affine_kernel(%arg0: i32, %arg1: memref<6xf32, #tpu.memory_space<smem>>, %arg2: memref<2x384xf32, #tpu.memory_space<vmem>>, %arg3: memref<2x384xf32, #tpu.memory_space<vmem>>) attributes {dimension_semantics = [#tpu.dimension_semantics<parallel>], iteration_bounds = array<i64: 1>, scalar_prefetch = 0 : i64, scratch_operands = 0 : i64, tpu.core_type = #tpu.core_type<tc>, window_params = [{transform_indices = @transform_0, window_bounds = array<i64: 6>}, {transform_indices = @transform_1, window_bounds = array<i64: 2, 384>}, {transform_indices = @transform_2, window_bounds = array<i64: 2, 384>}]} {
    %c0 = arith.constant 0 : index
    %c0_0 = arith.constant 0 : index
    %0 = vector.load %arg2[%c0, %c0_0] : memref<2x384xf32, #tpu.memory_space<vmem>>, vector<2x384xf32>
    %1 = vector.extract_strided_slice %0 {offsets = [0, 0], sizes = [1, 384], strides = [1, 1]} : vector<2x384xf32> to vector<1x384xf32>
    %2 = vector.extract_strided_slice %0 {offsets = [1, 0], sizes = [1, 384], strides = [1, 1]} : vector<2x384xf32> to vector<1x384xf32>
    %c0_1 = arith.constant 0 : index
    %3 = memref.load %arg1[%c0_1] : memref<6xf32, #tpu.memory_space<smem>>
    %c1 = arith.constant 1 : index
    %4 = memref.load %arg1[%c1] : memref<6xf32, #tpu.memory_space<smem>>
    %c2 = arith.constant 2 : index
    %5 = memref.load %arg1[%c2] : memref<6xf32, #tpu.memory_space<smem>>
    %c3 = arith.constant 3 : index
    %6 = memref.load %arg1[%c3] : memref<6xf32, #tpu.memory_space<smem>>
    %c4 = arith.constant 4 : index
    %7 = memref.load %arg1[%c4] : memref<6xf32, #tpu.memory_space<smem>>
    %c5 = arith.constant 5 : index
    %8 = memref.load %arg1[%c5] : memref<6xf32, #tpu.memory_space<smem>>
    %9 = vector.broadcast %3 : f32 to vector<1x384xf32>
    %10 = arith.mulf %1, %9 : vector<1x384xf32>
    %11 = vector.broadcast %5 : f32 to vector<1x384xf32>
    %12 = arith.mulf %2, %11 : vector<1x384xf32>
    %13 = arith.addf %10, %12 : vector<1x384xf32>
    %14 = vector.broadcast %7 : f32 to vector<1x384xf32>
    %15 = arith.addf %13, %14 : vector<1x384xf32>
    %16 = vector.broadcast %4 : f32 to vector<1x384xf32>
    %17 = arith.mulf %1, %16 : vector<1x384xf32>
    %18 = vector.broadcast %6 : f32 to vector<1x384xf32>
    %19 = arith.mulf %2, %18 : vector<1x384xf32>
    %20 = arith.addf %17, %19 : vector<1x384xf32>
    %21 = vector.broadcast %8 : f32 to vector<1x384xf32>
    %22 = arith.addf %20, %21 : vector<1x384xf32>
    %23 = tpu.concatenate %15, %22 in 0 : vector<1x384xf32>, vector<1x384xf32> -> vector<2x384xf32>
    %c0_2 = arith.constant 0 : index
    %c0_3 = arith.constant 0 : index
    %24 = vector.load %arg3[%c0_2, %c0_3] : memref<2x384xf32, #tpu.memory_space<vmem>>, vector<2x384xf32>
    tpu.vector_store %arg3[%c0_2, %c0_3], %23 {strides = array<i32>} : memref<2x384xf32, #tpu.memory_space<vmem>>, vector<2x384xf32>,
    return
  }
  func.func @transform_0(%arg0: i32) -> i32 {
    %c0_i32 = arith.constant 0 : i32
    %c0_i32_0 = arith.constant 0 : i32
    return %c0_i32 : i32
  }
  func.func @transform_1(%arg0: i32) -> (i32, i32) {
    %c0_i32 = arith.constant 0 : i32
    %c0_i32_0 = arith.constant 0 : i32
    return %c0_i32, %arg0 : i32, i32
  }
  func.func @transform_2(%arg0: i32) -> (i32, i32) {
    %c0_i32 = arith.constant 0 : i32
    %c0_i32_0 = arith.constant 0 : i32
    return %c0_i32, %arg0 : i32, i32
  }
}

</mosaic_0001>

<bundles_post_ra>
// kernel: tpu_custom_call.1
= control target key start
LH: loop header
LB: loop body
LE: loop exit
PB: predicated region body
PF: predicated region fallthrough
CT: control target
= control target key end

     0   :  { %7 = vsyncpa [#allocation5], 0  ;;  %s218_s0 = inlined_call_operand.hbm [shape: f32[6], index: 0, kind: input, shape index: {}]   ;;  %s219_s1 = inlined_call_operand.hbm [shape: f32[2,384], index: 1, kind: input, shape index: {}]   ;;  %s220_s2 = inlined_call_operand.hbm [shape: f32[2,384], index: 2, kind: output, shape index: {}]  }
   0x1   :  { %8 = vsyncpa [#allocation3], 0 }
   0x2   :  { %9 = vsyncpa [#allocation4], 0  ;;  %s15_s11 = sshll.u32 %s218_s0, 4  ;;  %s24_s14 = sshll.u32 %s219_s1, 4  ;;  %s16_s11 = int_to_ptr.hbm [resolvable:$true] %s15_s11  ;;  %s25_s14 = int_to_ptr.hbm [resolvable:$true] %s24_s14 }
   0x3   :  { %s191_s15 = smov [#allocation2]   ;;  %s192_s16 = smov [#allocation6]  }
   0x4   :  { %18 = dma.hbm_to_smem %s16_s11, 16, %s191_s15, [#allocation5]  }
   0x5   :  { %s26_s17 = sshll.u32 %s192_s16, 4  ;;  %s27_s17 = int_to_ptr.vmem [resolvable:$true] %s26_s17 }
   0x6   :  { %29 = dma.hbm_to_vmem [thread:$0]  %s25_s14, 96, %s27_s17, [#allocation3]  }
   0x7   :  { %185 = dma.done.wait [#allocation5], 16  }
   0x8   :  { %186 = vsyncadd [#allocation5], 4294967280 }
   0x9   :  { %187 = dma.done.wait [#allocation3], 96  }
   0xa   :  { %188 = vsyncadd [#allocation3], 4294967200 }
   0xb   :  { %38 = sfence }
   0xc   :  { %s40_s18 = sld [smem:[#allocation2]]  ;;  %v39_v0 = vld [vmem:[#allocation6] sm:$0x3f]  ;;  %vm82_vm0 = vcmask 1040384   ;;  %vm91_vm1 = vcmask 1041408   ;;  %s193_s1 = smov [#allocation7]  }
   0xd   :  { %s115_s19 = sld [smem:[#allocation2 + $0x1]]  ;;  %s102_s23 = sshll.u32 %s193_s1, 4  ;;  %vm93_vm2 = vcmask 1043456   ;;  %s103_s23 = int_to_ptr.vmem [resolvable:$true] %s102_s23 }
   0xe   :  { %s116_s0 = sld [smem:[#allocation2 + $0x2]]  ;;  %s104_s26 = sshll.u32 %s220_s2, 4  ;;  %s105_s26 = int_to_ptr.hbm [resolvable:$true] %s104_s26 }
   0xf   :  { %s117_s20 = sld [smem:[#allocation2 + $0x3]] }
  0x10   :  { %s118_s21 = sld [smem:[#allocation2 + $0x4]] }
  0x11   :  { %s119_s22 = sld [smem:[#allocation2 + $0x5]] }
  0x12   :  { %v46_v1 = vstv %s40_s18 }
  0x13   :  { %v57_v2 = vstv %s115_s19  ;;  %v47_v4 = vmul.f32 %v46_v1, %v39_v0 }
  0x14   :  { %v48_v3 = vstv %s116_s0  ;;  %v58_v7 = vmul.f32 %v57_v2, %v39_v0 }
  0x15   :  { %v49_v5 = vmul.f32 %v48_v3, %v39_v0  ;;  %v59_v6 = vstv %s117_s20 }
  0x16   :  { %v60_v8 = vmul.f32 %v59_v6, %v39_v0  ;;  %v55_v10 = vstv %s118_s21 }
  0x17   :  { %v120_v9 = vrot.slane %v49_v5, 9  ;;  %v66_v13 = vstv %s119_s22 }
  0x18   :  { %v121_v11 = vrot.slane %v60_v8, 9 }
  0x19   :  { %v54_v12 = vadd.f32 %v120_v9, %v47_v4 }
  0x1a   :  { %v65_v14 = vadd.f32 %v121_v11, %v58_v7 }
  0x1b   :  { %v56_v15 = vadd.f32 %v55_v10, %v54_v12 }
  0x1c   :  { %v67_v16 = vadd.f32 %v66_v13, %v65_v14 }
  0x1d   :  { %v69_v17 = vperm.slane %v56_v15, 0  ;;  %v70_v18 = vperm.slane %v56_v15, 2  ;;  %v71_v19 = vperm.slane %v56_v15, 4 }
  0x1e   :  { %v76_v20 = vperm.slane %v67_v16, 0  ;;  %v77_v21 = vperm.slane %v67_v16, 2  ;;  %v78_v22 = vperm.slane %v67_v16, 4 }
  0x20   :  { %v83_v23 = vsel %vm82_vm0, %v69_v17, %v76_v20  ;;  %v84_v24 = vsel %vm82_vm0, %v70_v18, %v77_v21  ;;  %v85_v25 = vsel %vm82_vm0, %v71_v19, %v78_v22 }
  0x21   :  { %v89_v26 = vrot.slane %v84_v24, 6  ;;  %v90_v27 = vrot.slane %v85_v25, 4 }
  0x23   :  { %v92_v28 = vsel %vm91_vm1, %v83_v23, %v89_v26 }
  0x24   :  { %v94_v29 = vsel %vm93_vm2, %v92_v28, %v90_v27 }
  0x25   :  { %96 = vst [vmem:[#allocation7] sm:$0x3f] %v94_v29 }
  0x26   :  { %107 = dma.vmem_to_hbm [thread:$0]  %s103_s23, 96, %s105_s26, [#allocation4]  }
  0x27   :  { %189 = dma.done.wait [#allocation4], 96  }
  0x28   :  { %190 = vsyncadd [#allocation4], 4294967200 }
  0x29   :  { %112 = vsyncpa [#allocation3], 1 }
  0x2a   :  { %113 = vsyncpa [#allocation4], 1 }
  0x2b   :  { %114 = vsyncpa [#allocation5], 1 }

</bundles_post_ra>
